<compile_context>
chip_gen: v7x
topology: tpu7x:2x2x1
jax: 0.10.0
libtpu: 0.0.40
codegen_flags: <defaults>
</compile_context>

<pallas_src>
import math
from functools import partial

import jax
import jax.numpy as jnp
from jax.experimental import pallas as pl
from jax.experimental.pallas import tpu as pltpu


def _build_pe(d_model: int, max_len: int = 5000, dtype=jnp.float32) -> jnp.ndarray:
    """Sinusoidal table, returned as (max_len, 1, d_model) like the torch buffer."""
    position = jnp.arange(max_len, dtype=jnp.float32)[:, None]            # (L, 1)
    div_term = jnp.exp(
        jnp.arange(0, d_model, 2, dtype=jnp.float32) * (-math.log(10000.0) / d_model)
    )                                                                      # (d_model/2,)
    angles = position * div_term                                           # (L, d_model/2)
    pe = jnp.zeros((max_len, d_model), dtype=jnp.float32)
    pe = pe.at[:, 0::2].set(jnp.sin(angles))
    pe = pe.at[:, 1::2].set(jnp.cos(angles))
    return pe[:, None, :].astype(dtype)                                    # (L, 1, d_model)


# ---------------------------------------------------------------------------
# Kernels
# ---------------------------------------------------------------------------

def _pe_add_kernel_3d(x_ref, pe_ref, o_ref):
    # x_ref / o_ref: (ts, B, D); pe_ref: (ts, D), broadcast over the batch axis.
    o_ref[...] = x_ref[...] + pe_ref[...][:, None, :]


def _pe_add_kernel_2d(x_ref, pe_ref, o_ref, *, batch, d_model):
    # x_ref / o_ref: (ts, B*D) lane-dense; pe_ref: (ts, D).
    # Static unroll over batch (< 8); each slice is D (multiple of 128) lanes wide,
    # so every load/store is lane-aligned and unmasked.
    pe = pe_ref[...]
    for b in range(batch):
        sl = slice(b * d_model, (b + 1) * d_model)
        o_ref[:, sl] = x_ref[:, sl] + pe


# ---------------------------------------------------------------------------
# Tiling helpers
# ---------------------------------------------------------------------------

def _round_up(x: int, m: int) -> int:
    return ((x + m - 1) // m) * m


def _num_tensorcores() -> int:
    """TensorCores per chip: 2 on v7x, 1 on v5e/v6e. Conservative fallback = 1."""
    try:
        info = pltpu.get_tpu_info()
        for name in ("num_tensorcores", "tensorcore_count", "num_cores",
                     "cores_per_chip"):
            n = getattr(info, name, None)
            if isinstance(n, int) and n > 0:
                return n
    except Exception:
        pass
    try:
        if "v7" in jax.devices()[0].device_kind.lower():
            return 2
    except Exception:
        pass
    return 1


def _choose_seq_tile(S: int, bytes_per_pos: int, num_tc: int, *, ts_align: int = 1,
                     target_bytes: int = 4 * 1024 * 1024,
                     min_split_bytes: int = 1024 * 1024) -> int:
    """Sequence positions per grid step.

    Targets ~target_bytes of (VMEM-padded) x bytes per step.  Only forces a
    multi-step grid on multi-TensorCore chips (megacore sharding), and then
    rounds the realized step count to an even number so both cores finish
    together.  Single-TC chips get the biggest tile that fits the target.
    """
    ts = max(1, target_bytes // max(bytes_per_pos, 1))
    ts = max(ts_align, (ts // ts_align) * ts_align)
    ts = min(ts, S)
    if num_tc > 1 and S > 1 and S * bytes_per_pos >= 2 * min_split_bytes:
        steps = max(pl.cdiv(S, ts), 2)
        if steps % 2:
            steps += 1
        t = min(S, max(ts_align, _round_up(pl.cdiv(S, steps), ts_align)))
        for _ in range(16):             # nudge down to an even realized step count
            if pl.cdiv(S, t) % 2 == 0 or t <= ts_align:
                break
            t -= ts_align
        if pl.cdiv(S, t) % 2 == 0:
            ts = t
    return int(max(1, min(ts, S)))


# ---------------------------------------------------------------------------
# Wrapper
# ---------------------------------------------------------------------------

def positional_encoding(x: jnp.ndarray, pe: jnp.ndarray, *,
                        target_bytes: int = 4 * 1024 * 1024,
                        donate_x: bool = False) -> jnp.ndarray:
    """x: (S, B, D); pe: (max_len, 1, D) or (max_len, D).  Returns x + pe[:S]."""
    S, B, D = x.shape
    if pe.ndim == 3:
        pe = pe[:, 0, :]                                   # (max_len, D)
    max_len, d_model = pe.shape
    if d_model != D:
        raise ValueError(f"d_model mismatch: x has {D}, pe table has {d_model}")
    if S > max_len:
        raise ValueError(f"seq_len {S} exceeds positional-encoding max_len {max_len}")

    pe_s = pe[:S]
    if pe_s.dtype != x.dtype:          # no-op when the caller caches a pre-cast table
        pe_s = pe_s.astype(x.dtype)

    itemsize = jnp.dtype(x.dtype).itemsize
    sub = 8 * max(1, 4 // itemsize)    # sublane tile: 8 f32 / 16 bf16 / 32 int8
    num_tc = _num_tensorcores()

    # Lane-dense presentation for small batch: (S, B, D) -> (S, B*D) is a free
    # row-major reshape; avoids 8/B sublane padding and masked (vst.msk) stores.
    use_2d = (B < 8) and (D % 128 == 0)

    if use_2d:
        bytes_per_pos = _round_up(B * D, 128) * itemsize
        ts = _choose_seq_tile(S, bytes_per_pos, num_tc, ts_align=8,
                              target_bytes=target_bytes)
        x_in = x.reshape(S, B * D)
        kernel = partial(_pe_add_kernel_2d, batch=B, d_model=D)
        in_specs = [pl.BlockSpec((ts, B * D), lambda s: (s, 0)),
                    pl.BlockSpec((ts, D), lambda s: (s, 0))]
        out_spec = pl.BlockSpec((ts, B * D), lambda s: (s, 0))
        out_shape = jax.ShapeDtypeStruct((S, B * D), x.dtype)
    else:
        bytes_per_pos = _round_up(B, sub) * _round_up(D, 128) * itemsize
        ts = _choose_seq_tile(S, bytes_per_pos, num_tc, ts_align=1,
                              target_bytes=target_bytes)
        x_in = x
        kernel = _pe_add_kernel_3d
        in_specs = [pl.BlockSpec((ts, B, D), lambda s: (s, 0, 0)),
                    pl.BlockSpec((ts, D), lambda s: (s, 0))]
        out_spec = pl.BlockSpec((ts, B, D), lambda s: (s, 0, 0))
        out_shape = jax.ShapeDtypeStruct((S, B, D), x.dtype)

    grid = (pl.cdiv(S, ts),)

    # Explicit scoped-VMEM budget: 2*(x) + 2*(out) + 2*(pe) double-buffers + margin.
    x_buf = ts * bytes_per_pos
    pe_buf = _round_up(ts, sub) * _round_up(D, 128) * itemsize
    vmem_limit = 4 * x_buf + 2 * pe_buf + 2 * 1024 * 1024
    vmem_limit = int(min(max(vmem_limit, 16 * 1024 * 1024), 64 * 1024 * 1024))

    cost = pl.CostEstimate(
        flops=S * B * D,
        transcendentals=0,
        bytes_accessed=(2 * S * B * D + S * D) * itemsize,
    )

    out = pl.pallas_call(
        kernel,
        out_shape=out_shape,
        grid_spec=pltpu.PrefetchScalarGridSpec(
            num_scalar_prefetch=0,
            grid=grid,
            in_specs=in_specs,
            out_specs=out_spec,
        ),
        compiler_params=pltpu.CompilerParams(
            dimension_semantics=("parallel",),     # megacore sharding on v7x
            vmem_limit_bytes=vmem_limit,
        ),
        cost_estimate=cost,
        input_output_aliases=({0: 0} if donate_x else {}),
    )(x_in, pe_s)

    return out.reshape(S, B, D) if use_2d else out


if __name__ == "__main__":
    key = jax.random.PRNGKey(0)

    # --- Test 1: module-consistent small shape (3-D path, D not lane-aligned) ---
    seq_len, batch, d_model = 8, 2, 32
    pe = _build_pe(d_model, max_len=64, dtype=jnp.float32)   # built + cast once (cached)
    x = jax.random.normal(key, (seq_len, batch, d_model), dtype=jnp.float32)

    out = jax.block_until_ready(positional_encoding(x, pe))
    ref = x + pe[:seq_len]                                    # eval-mode dropout == identity
    assert out.shape == (seq_len, batch, d_model)
    assert jnp.allclose(out, ref, atol=1e-6), "3-D path mismatch vs reference"

    # --- Test 2: small-batch lane-dense path (B < 8, D % 128 == 0) ---
    seq_len2, batch2, d_model2 = 16, 2, 128
    pe2 = _build_pe(d_model2, max_len=32, dtype=jnp.float32)
    x2 = jax.random.normal(jax.random.PRNGKey(0), (seq_len2, batch2, d_model2),
                           dtype=jnp.float32)

    out2 = jax.block_until_ready(positional_encoding(x2, pe2))
    ref2 = x2 + pe2[:seq_len2]
    assert out2.shape == (seq_len2, batch2, d_model2)
    assert jnp.allclose(out2, ref2, atol=1e-6), "lane-dense path mismatch vs reference"

    print("KERNEL_OK")
</pallas_src>

<mosaic_0001>
module attributes {stable_mosaic.version = 11 : i64} {
  func.func @_pe_add_kernel_3d(%arg0: i32, %arg1: memref<8x2x32xf32, #tpu.memory_space<vmem>>, %arg2: memref<8x32xf32, #tpu.memory_space<vmem>>, %arg3: memref<8x2x32xf32, #tpu.memory_space<vmem>>) attributes {dimension_semantics = [#tpu.dimension_semantics<parallel>], iteration_bounds = array<i64: 1>, scalar_prefetch = 0 : i64, scratch_operands = 0 : i64, tpu.core_type = #tpu.core_type<tc>, window_params = [{transform_indices = @transform_0, window_bounds = array<i64: 8, 2, 32>}, {transform_indices = @transform_1, window_bounds = array<i64: 8, 32>}, {transform_indices = @transform_2, window_bounds = array<i64: 8, 2, 32>}]} {
    %c0 = arith.constant 0 : index
    %c0_0 = arith.constant 0 : index
    %c0_1 = arith.constant 0 : index
    %0 = vector.load %arg1[%c0, %c0_0, %c0_1] : memref<8x2x32xf32, #tpu.memory_space<vmem>>, vector<8x2x32xf32>
    %c0_2 = arith.constant 0 : index
    %c0_3 = arith.constant 0 : index
    %1 = vector.load %arg2[%c0_2, %c0_3] : memref<8x32xf32, #tpu.memory_space<vmem>>, vector<8x32xf32>
    %2 = vector.shape_cast %1 : vector<8x32xf32> to vector<8x1x32xf32>
    %3 = vector.broadcast %2 : vector<8x1x32xf32> to vector<8x2x32xf32>
    %4 = arith.addf %0, %3 : vector<8x2x32xf32>
    %c0_4 = arith.constant 0 : index
    %c0_5 = arith.constant 0 : index
    %c0_6 = arith.constant 0 : index
    %5 = vector.load %arg3[%c0_4, %c0_5, %c0_6] : memref<8x2x32xf32, #tpu.memory_space<vmem>>, vector<8x2x32xf32>
    tpu.vector_store %arg3[%c0_4, %c0_5, %c0_6], %4 {strides = array<i32>} : memref<8x2x32xf32, #tpu.memory_space<vmem>>, vector<8x2x32xf32>,
    return
  }
  func.func @transform_0(%arg0: i32) -> (i32, i32, i32) {
    %c0_i32 = arith.constant 0 : i32
    %c0_i32_0 = arith.constant 0 : i32
    %c0_i32_1 = arith.constant 0 : i32
    return %arg0, %c0_i32, %c0_i32_0 : i32, i32, i32
  }
  func.func @transform_1(%arg0: i32) -> (i32, i32) {
    %c0_i32 = arith.constant 0 : i32
    %c0_i32_0 = arith.constant 0 : i32
    return %arg0, %c0_i32 : i32, i32
  }
  func.func @transform_2(%arg0: i32) -> (i32, i32, i32) {
    %c0_i32 = arith.constant 0 : i32
    %c0_i32_0 = arith.constant 0 : i32
    %c0_i32_1 = arith.constant 0 : i32
    return %arg0, %c0_i32, %c0_i32_0 : i32, i32, i32
  }
}

</mosaic_0001>

<bundles_post_ra>
// kernel: tpu_custom_call.1
= control target key start
LH: loop header
LB: loop body
LE: loop exit
PB: predicated region body
PF: predicated region fallthrough
CT: control target
= control target key end

     0   :  { %7 = vsyncpa [#allocation3], 0  ;;  %s321_s0 = inlined_call_operand.hbm [shape: f32[8,2,32], index: 0, kind: input, shape index: {}]   ;;  %s322_s1 = inlined_call_operand.hbm [shape: f32[8,32], index: 1, kind: input, shape index: {}]   ;;  %s323_s2 = inlined_call_operand.hbm [shape: f32[8,2,32], index: 2, kind: output, shape index: {}]  }
   0x1   :  { %8 = vsyncpa [#allocation6], 0 }
   0x2   :  { %9 = vsyncpa [#allocation4], 0  ;;  %s250_s9 = smov [#allocation2]   ;;  %s178_s13 = scalar_lea.hbm %s321_s0, 256 }
   0x3   :  { %s15_s10 = sshll.u32 %s250_s9, 4  ;;  %p179_p0 = scmp.ne.s32.totalorder %s321_s0, %s178_s13  ;;  %s16_s10 = int_to_ptr.vmem [resolvable:$true] %s15_s10 }
   0x4   :  { %p182_p1 = scmp.lt.u32.totalorder %s178_s13, %s321_s0 }
   0x6   :  { %p184_p2 = pnand %p182_p1, %p179_p0 }
   0x8   :  { %187 = shalt.err (!%p184_p2)
}
   0x9   :  { %s188_s18 = scalar_lea.vmem %s16_s10, 256  ;;  %p193_p4 = scmp.lt.s32.totalorder %s16_s10, %s16_s10 }
   0xa   :  { %p189_p3 = scmp.ne.s32.totalorder %s16_s10, %s188_s18  ;;  %p194_p5 = scmp.lt.s32.totalorder %s188_s18, %s188_s18 }
   0xc   :  { %p195_p6 = por %p194_p5, %p193_p4 }
   0xe   :  { %p196_p7 = pnand %p195_p6, %p189_p3 }
  0x10   :  { %199 = shalt.err (!%p196_p7)
}
  0x11   :  { %s251_s19 = smov 32   ;;  %s252_s20 = smov 2  }
  0x12   :  { %21 = dma.hbm_to_vmem [thread:$0]  %s321_s0, 256, %s16_s10, [#allocation3], %s251_s19, %s251_s19, %s252_s20  }
  0x13   :  { %s253_s23 = smov [#allocation5]   ;;  %s200_s27 = scalar_lea.hbm %s322_s1, 128 }
  0x14   :  { %s28_s24 = sshll.u32 %s253_s23, 4  ;;  %p201_p8 = scmp.ne.s32.totalorder %s322_s1, %s200_s27  ;;  %s29_s24 = int_to_ptr.vmem [resolvable:$true] %s28_s24 }
  0x15   :  { %p204_p9 = scmp.lt.u32.totalorder %s200_s27, %s322_s1 }
  0x17   :  { %p206_p10 = pnand %p204_p9, %p201_p8 }
  0x19   :  { %209 = shalt.err (!%p206_p10)
}
  0x1a   :  { %s210_s4 = scalar_lea.vmem %s29_s24, 128  ;;  %p215_p12 = scmp.lt.s32.totalorder %s29_s24, %s29_s24 }
  0x1b   :  { %p211_p11 = scmp.ne.s32.totalorder %s29_s24, %s210_s4  ;;  %p216_p13 = scmp.lt.s32.totalorder %s210_s4, %s210_s4 }
  0x1d   :  { %p217_p0 = por %p216_p13, %p215_p12 }
  0x1f   :  { %p218_p1 = pnand %p217_p0, %p211_p11 }
  0x21   :  { %221 = shalt.err (!%p218_p1)
}
  0x22   :  { %31 = dma.hbm_to_vmem [thread:$0]  %s322_s1, 128, %s29_s24, [#allocation6]  }
  0x23   :  { %244 = dma.done.wait [#allocation3], 256  }
  0x24   :  { %245 = vsyncadd [#allocation3], 4294967040 }
  0x25   :  { %246 = dma.done.wait [#allocation6], 128  }
  0x26   :  { %247 = vsyncadd [#allocation6], 4294967168  ;;  %v52_v0 = vlaneseq  ;;  %v254_v1 = vmov 1966171168   ;;  %v46_v6 = vld [vmem:[#allocation5] sm:$0xff]  ;;  %vm145_vm0 = vcmask 254976  }
  0x27   :  { %v50_v2 = vunpack.c.l.s4 %v254_v1  ;;  %v48_v9 = vcombine.high %v46_v6, %v46_v6  ;;  %v38_v13 = vld [vmem:[#allocation2] sm:$0x3]  ;;  %v39_v18 = vld [vmem:[#allocation2 + $0x2] sm:$0x3]  ;;  %v40_v19 = vld [vmem:[#allocation2 + $0x4] sm:$0x3] }
  0x28   :  { %v53_v3 = vshrl.u32 %v52_v0, 7  ;;  %v42_v25 = vld [vmem:[#allocation2 + $0x8] sm:$0x3]  ;;  %v41_v26 = vld [vmem:[#allocation2 + $0x6] sm:$0x3]  ;;  %s255_s1 = smov [#allocation7]  }
  0x29   :  { %v51_v4 = vunpack.c.0.s8 %v50_v2  ;;  %v43_v33 = vld [vmem:[#allocation2 + $0xa] sm:$0x3]  ;;  %v44_v34 = vld [vmem:[#allocation2 + $0xc] sm:$0x3]  ;;  %v45_v40 = vld [vmem:[#allocation2 + $0xe] sm:$0x3] }
  0x2a   :  { %v99_v8 = vsub.s32 0, %v53_v3  ;;  %s159_s6 = sshll.u32 %s255_s1, 4  ;;  %s160_s6 = int_to_ptr.vmem [resolvable:$true] %s159_s6 }
  0x2b   :  { %v54_v5 = vsub.s32 %v51_v4, %v53_v3  ;;  %s222_s7 = scalar_lea.vmem %s160_s6, 256  ;;  %p227_p3 = scmp.lt.s32.totalorder %s160_s6, %s160_s6 }
  0x2c   :  { %p223_p2 = scmp.ne.s32.totalorder %s160_s6, %s222_s7  ;;  %p228_p4 = scmp.lt.s32.totalorder %s222_s7, %s222_s7 }
  0x2d   :  { %v55_v7 = vrot.slane %v46_v6, %v54_v5  ;;  %v62_v12 = vrot.slane %v48_v9, %v54_v5 }
  0x2e   :  { %p229_p5 = por %p228_p4, %p227_p3 }
  0x2f   :  { %v71_v10 = vrot.slane %v55_v7, %v54_v5  ;;  %v63_v11 = vcombine.high %v55_v7, %v55_v7  ;;  %v78_v17 = vrot.slane %v62_v12, %v54_v5  ;;  %v64_v20 = vcombine.high %v62_v12, %v62_v12 }
  0x30   :  { %p230_p6 = pnand %p229_p5, %p223_p2 }
  0x31   :  { %v100_v14 = vrot.slane %v71_v10, %v99_v8  ;;  %v85_v15 = vrot.slane %v63_v11, %v54_v5  ;;  %v93_v16 = vcombine.high %v71_v10, %v71_v10  ;;  %v116_v27 = vrot.slane %v78_v17, %v99_v8 }
  0x32   :  { %v92_v28 = vrot.slane %v64_v20, %v54_v5  ;;  %v94_v29 = vcombine.high %v78_v17, %v78_v17 }
  0x33   :  { %v137_v21 = vadd.f32 %v100_v14, %v38_v13  ;;  %v104_v22 = vrot.slane %v85_v15, %v99_v8  ;;  %v108_v23 = vrot.slane %v93_v16, %v99_v8  ;;  %v95_v24 = vcombine.high %v85_v15, %v85_v15 }
  0x34   :  { %v141_v35 = vadd.f32 %v116_v27, %v42_v25  ;;  %v120_v36 = vrot.slane %v92_v28, %v99_v8  ;;  %v124_v37 = vrot.slane %v94_v29, %v99_v8  ;;  %v96_v38 = vcombine.high %v92_v28, %v92_v28 }
  0x35   :  { %146 = vst.msk [vmem:[#allocation7] sm:$0x3] %vm145_vm0, %v137_v21  ;;  %v138_v30 = vadd.f32 %v104_v22, %v39_v18  ;;  %v139_v31 = vadd.f32 %v108_v23, %v40_v19  ;;  %v112_v32 = vrot.slane %v95_v24, %v99_v8 }
  0x36   :  { %150 = vst.msk [vmem:[#allocation7 + $0x8] sm:$0x3] %vm145_vm0, %v141_v35  ;;  %v142_v41 = vadd.f32 %v120_v36, %v43_v33  ;;  %v143_v42 = vadd.f32 %v124_v37, %v44_v34  ;;  %v128_v43 = vrot.slane %v96_v38, %v99_v8 }
  0x37   :  { %147 = vst.msk [vmem:[#allocation7 + $0x2] sm:$0x3] %vm145_vm0, %v138_v30  ;;  %148 = vst.msk [vmem:[#allocation7 + $0x4] sm:$0x3] %vm145_vm0, %v139_v31  ;;  %v140_v39 = vadd.f32 %v112_v32, %v41_v26 }
  0x38   :  { %151 = vst.msk [vmem:[#allocation7 + $0xa] sm:$0x3] %vm145_vm0, %v142_v41  ;;  %152 = vst.msk [vmem:[#allocation7 + $0xc] sm:$0x3] %vm145_vm0, %v143_v42  ;;  %v144_v44 = vadd.f32 %v128_v43, %v45_v40 }
  0x39   :  { %149 = vst.msk [vmem:[#allocation7 + $0x6] sm:$0x3] %vm145_vm0, %v140_v39 }
  0x3a   :  { %153 = vst.msk [vmem:[#allocation7 + $0xe] sm:$0x3] %vm145_vm0, %v144_v44 }
  0x3b   :  { %233 = shalt.err (!%p230_p6)
}
  0x3c   :  { %s234_s10 = scalar_lea.hbm %s323_s2, 256 }
  0x3d   :  { %p235_p7 = scmp.ne.s32.totalorder %s323_s2, %s234_s10  ;;  %p238_p8 = scmp.lt.u32.totalorder %s234_s10, %s323_s2 }
  0x3f   :  { %p240_p9 = pnand %p238_p8, %p235_p7 }
  0x41   :  { %243 = shalt.err (!%p240_p9)
}
  0x42   :  { %165 = dma.vmem_to_hbm [thread:$0]  %s160_s6, 256, %s323_s2, [#allocation4], %s251_s19, %s251_s19, %s252_s20  }
  0x43   :  { %248 = dma.done.wait [#allocation4], 256  }
  0x44   :  { %249 = vsyncadd [#allocation4], 4294967040 }
  0x45   :  { %169 = vsyncpa [#allocation3], 1 }
  0x46   :  { %170 = vsyncpa [#allocation6], 1 }
  0x47   :  { %171 = vsyncpa [#allocation4], 1 }

</bundles_post_ra>
